<compile_context>
chip_gen: v7x
topology: tpu7x:2x2x1
jax: 0.10.0
libtpu: 0.0.40
codegen_flags: <defaults>
</compile_context>

<pallas_src>
import functools

import jax
import jax.numpy as jnp
import numpy as np
from jax.experimental import pallas as pl
from jax.experimental.pallas import tpu as pltpu


def _round_up(x: int, m: int) -> int:
    return ((x + m - 1) // m) * m


def _vmem_capacity_bytes() -> int:
    """Physical per-core VMEM (v5e/v6e: 128 MiB, v7x: 64 MiB).

    Conservative 64 MiB fallback if the query is unavailable, so the derived
    budget (<=48 MiB) is safe on every generation.
    """
    try:
        return int(pltpu.get_tpu_info().vmem_capacity_bytes)
    except Exception:
        return 64 * 1024 * 1024


def _pick_token_block(n_tokens, n_tags, logits_itemsize, vmem_capacity):
    """Largest lane (token) block that fits the padded, double-buffered VMEM budget."""
    # Sublane granule: 8 rows for 4-byte elements, 16 for 2-byte (bf16).
    granule = 8 * (4 // logits_itemsize)
    t_pad = _round_up(n_tags, granule)       # logits tile sublanes (input dtype)
    t_pad_f32 = _round_up(n_tags, 8)         # f32-width intermediate sublanes

    # Padded VMEM bytes per token lane at steady state:
    #   logits window : 2 (double buffer) x t_pad sublanes x itemsize
    #   tags window   : 2 x 8 (sublane pad of the (1, TL) int32 tile) x 4
    #   f32 intermediates (exp block, iota/select temps): generous 4-copy headroom
    per_lane = (2 * t_pad * logits_itemsize) + (2 * 8 * 4) + (4 * t_pad_f32 * 4)

    # Per-generation budget: <= 75% of physical VMEM, capped at 64 MiB
    # (v5e/v6e -> 64 MiB of 128; v7x -> 48 MiB of 64).
    budget = min((vmem_capacity * 3) // 4, 64 * 1024 * 1024)
    tile_budget = (budget * 85) // 100       # headroom for compiler-internal scratch

    tl_cap = max(128, ((tile_budget // per_lane) // 128) * 128)

    if n_tokens <= 128:
        return n_tokens, budget              # single full-extent block

    # Keep >= 2 blocks so dimension_semantics=("parallel",) can shard the grid
    # across the two v7x TensorCores.
    half = ((n_tokens // 2) // 128) * 128
    tl = max(128, min(tl_cap, max(half, 128)))
    return tl, budget


def _seq_labeler_partial_kernel(logits_ref, tags_ref, out_ref, *, n_tokens,
                                needs_token_mask):
    """One grid step processes a lane block of TL tokens (tags on sublanes).

    logits_ref : (T, TL)  logits block, tags on sublanes, tokens on lanes
    tags_ref   : (1, TL)  int32 target tag per token
    out_ref    : (1, 1)   f32 partial sum of target log-probs for this block
    """
    x = logits_ref[...]                                       # (T, TL), f32 or bf16
    tags = tags_ref[...]                                      # (1, TL) int32
    n_tags, tl = x.shape

    # Per-token max over the tag (sublane) axis -- stays in the input dtype
    # (bf16 VALU on v6e/v7x; no eager f32 copy of the whole block).
    m = jnp.max(x, axis=0, keepdims=True)                     # (1, TL)

    # Upcast only the exp argument; accumulate in f32.
    e = jnp.exp((x - m).astype(jnp.float32))                  # (T, TL) f32
    lse = m.astype(jnp.float32) + jnp.log(
        jnp.sum(e, axis=0, keepdims=True))                    # (1, TL)

    # Target logit via one-hot select over sublanes (no gather, no full
    # log-prob tensor); the one-hot sum is exact in the input dtype.
    tag_iota = jax.lax.broadcasted_iota(jnp.int32, x.shape, 0)     # (T, TL)
    tgt = jnp.sum(jnp.where(tag_iota == tags, x, jnp.zeros_like(x)),
                  axis=0, keepdims=True).astype(jnp.float32)       # (1, TL)

    log_prob = tgt - lse                                      # (1, TL)

    if needs_token_mask:  # static bool: only compiled when n_tokens % TL != 0
        tok = pl.program_id(0) * tl + jax.lax.broadcasted_iota(
            jnp.int32, (1, tl), 1)
        # Keep this mask AFTER the lse: it is what neutralizes NaN/Inf coming
        # from garbage lanes of the padded last block.
        log_prob = jnp.where(tok < n_tokens, log_prob, jnp.float32(0.0))

    out_ref[...] = jnp.sum(log_prob).reshape(1, 1)


def sequence_labeler_loss(logits, mask, tags):
    """JAX/Pallas equivalent of SequenceLabeler.forward -> scalar loss."""
    seq_len = tags.shape[-1]
    tags2 = jnp.reshape(tags, (-1, seq_len)).astype(jnp.int32)
    n_rows = tags2.shape[0]
    n_tags = logits.shape[-1]
    assert logits.shape == (n_rows, seq_len, n_tags)

    # The log(mask + eps) term of masked_log_softmax cancels in log_softmax
    # (see header), so the kernel never touches the mask.
    del mask

    if logits.dtype not in (jnp.bfloat16, jnp.float32):
        logits = logits.astype(jnp.float32)

    n_tokens = n_rows * seq_len

    # Lane-dense re-layout: tags -> sublanes, tokens -> 128-lane axis.
    # One XLA transpose pass over HBM; removes the 128/n_tags padding waste
    # in VMEM / VPU / EUP inside the kernel.
    logits_t = jnp.transpose(jnp.reshape(logits, (n_tokens, n_tags)))  # (T, NT)
    tags_flat = jnp.reshape(tags2, (1, n_tokens))                      # (1, NT)

    itemsize = jnp.dtype(logits.dtype).itemsize
    tl, vmem_limit = _pick_token_block(n_tokens, n_tags, itemsize,
                                       _vmem_capacity_bytes())
    num_blocks = int(pl.cdiv(n_tokens, tl))

    kernel = functools.partial(
        _seq_labeler_partial_kernel,
        n_tokens=n_tokens,
        needs_token_mask=(n_tokens % tl != 0),
    )

    partials = pl.pallas_call(
        kernel,
        out_shape=jax.ShapeDtypeStruct((num_blocks, 1), jnp.float32),
        grid=(num_blocks,),
        in_specs=[
            pl.BlockSpec((n_tags, tl), lambda i: (0, i)),
            pl.BlockSpec((1, tl), lambda i: (0, i)),
        ],
        out_specs=pl.BlockSpec((1, 1), lambda i: (i, 0)),
        compiler_params=pltpu.CompilerParams(
            dimension_semantics=("parallel",),
            vmem_limit_bytes=int(vmem_limit),
        ),
    )(logits_t, tags_flat)

    # Final reduce / normalize outside the kernel: -sum(lp_target) / N rows.
    return -jnp.sum(partials) / jnp.float32(n_rows)


if __name__ == "__main__":
    key = jax.random.PRNGKey(0)
    k1, k2, k3 = jax.random.split(key, 3)

    def reference_loss(logits, mask, tags):
        # Pure-JAX reference, faithful to the PyTorch module's masked_log_softmax
        # (tiny non-denormal eps so the reference itself is TPU-safe; the additive
        # log(mask+eps) constant cancels in log_softmax either way).
        s = tags.shape[-1]
        m2 = mask.reshape(-1, s)
        t2 = tags.reshape(-1, s)
        n = t2.shape[0]
        vec = logits.astype(jnp.float32) + jnp.log(m2 + jnp.float32(1e-30))[..., None]
        lp = jax.nn.log_softmax(vec, axis=-1)
        gathered = jnp.take_along_axis(lp, t2[..., None], axis=-1)
        return -jnp.sum(gathered) / n

    # --- Test 1: small module-spec shapes (single full-extent token block). ---
    batch, query, seq_len, n_tags = 2, 2, 8, 16
    n_rows = batch * query
    logits = jax.random.normal(k1, (n_rows, seq_len, n_tags), dtype=jnp.float32)
    mask = (jax.random.uniform(k2, (batch, query, seq_len)) > 0.2).astype(jnp.float32)
    tags = jax.random.randint(k3, (batch, query, seq_len), 0, n_tags, dtype=jnp.int32)

    loss = jax.block_until_ready(sequence_labeler_loss(logits, mask, tags))
    ref = reference_loss(logits, mask, tags)
    np.testing.assert_allclose(np.asarray(loss), np.asarray(ref), rtol=1e-5, atol=1e-5)

    # --- Test 2: multi-block grid + partial last block (token-mask path). ---
    k4, k5, k6 = jax.random.split(k1, 3)
    b2, q2, s2, t2n = 2, 2, 40, 16                      # 160 tokens -> 2 blocks of 128
    logits_b = jax.random.normal(k4, (b2 * q2, s2, t2n), dtype=jnp.float32)
    mask_b = (jax.random.uniform(k5, (b2, q2, s2)) > 0.2).astype(jnp.float32)
    tags_b = jax.random.randint(k6, (b2, q2, s2), 0, t2n, dtype=jnp.int32)

    loss_b = jax.block_until_ready(sequence_labeler_loss(logits_b, mask_b, tags_b))
    ref_b = reference_loss(logits_b, mask_b, tags_b)
    np.testing.assert_allclose(np.asarray(loss_b), np.asarray(ref_b), rtol=1e-5, atol=1e-4)

    # --- Test 3: bf16 logits path (bf16 max/select, f32 exp/accumulate). ---
    logits_bf = logits.astype(jnp.bfloat16)
    loss_bf = jax.block_until_ready(sequence_labeler_loss(logits_bf, mask, tags))
    ref_bf = reference_loss(logits_bf.astype(jnp.float32), mask, tags)
    np.testing.assert_allclose(np.asarray(loss_bf), np.asarray(ref_bf), rtol=2e-2, atol=2e-2)

    print("KERNEL_OK")
</pallas_src>

<mosaic_0001>
module attributes {stable_mosaic.version = 11 : i64} {
  func.func @_seq_labeler_partial_kernel(%arg0: i32, %arg1: memref<16x32xf32, #tpu.memory_space<vmem>>, %arg2: memref<1x32xi32, #tpu.memory_space<vmem>>, %arg3: memref<1x1xf32, #tpu.memory_space<vmem>>) attributes {dimension_semantics = [#tpu.dimension_semantics<parallel>], iteration_bounds = array<i64: 1>, scalar_prefetch = 0 : i64, scratch_operands = 0 : i64, tpu.core_type = #tpu.core_type<tc>, window_params = [{transform_indices = @transform_0, window_bounds = array<i64: 16, 32>}, {transform_indices = @transform_1, window_bounds = array<i64: 1, 32>}, {transform_indices = @transform_2, window_bounds = array<i64: 1, 1>}]} {
    %c0 = arith.constant 0 : index
    %c0_0 = arith.constant 0 : index
    %0 = vector.load %arg1[%c0, %c0_0] : memref<16x32xf32, #tpu.memory_space<vmem>>, vector<16x32xf32>
    %c0_1 = arith.constant 0 : index
    %c0_2 = arith.constant 0 : index
    %1 = vector.load %arg2[%c0_1, %c0_2] : memref<1x32xi32, #tpu.memory_space<vmem>>, vector<1x32xi32>
    %cst = arith.constant dense<0xFF800000> : vector<32xf32>
    %2 = vector.multi_reduction <maximumf>, %0, %cst [0] : vector<16x32xf32> to vector<32xf32>
    %3 = vector.shape_cast %2 : vector<32xf32> to vector<1x32xf32>
    %4 = vector.broadcast %3 : vector<1x32xf32> to vector<16x32xf32>
    %5 = arith.subf %0, %4 : vector<16x32xf32>
    %6 = math.exp %5 : vector<16x32xf32>
    %cst_3 = arith.constant dense<0.000000e+00> : vector<32xf32>
    %7 = vector.multi_reduction <add>, %6, %cst_3 [0] : vector<16x32xf32> to vector<32xf32>
    %8 = vector.shape_cast %7 : vector<32xf32> to vector<1x32xf32>
    %9 = math.log %8 : vector<1x32xf32>
    %10 = arith.addf %3, %9 : vector<1x32xf32>
    %11 = tpu.iota {dimensions = array<i32: 0>} : vector<16x32xi32>
    %12 = vector.broadcast %1 : vector<1x32xi32> to vector<16x32xi32>
    %13 = arith.cmpi eq, %11, %12 : vector<16x32xi32>
    %cst_4 = arith.constant 0.000000e+00 : f32
    %14 = vector.broadcast %cst_4 : f32 to vector<16x32xf32>
    %15 = arith.select %13, %0, %14 : vector<16x32xi1>, vector<16x32xf32>
    %cst_5 = arith.constant dense<0.000000e+00> : vector<32xf32>
    %16 = vector.multi_reduction <add>, %15, %cst_5 [0] : vector<16x32xf32> to vector<32xf32>
    %17 = vector.shape_cast %16 : vector<32xf32> to vector<1x32xf32>
    %18 = arith.subf %17, %10 : vector<1x32xf32>
    %19 = vector.shape_cast %18 : vector<1x32xf32> to vector<1x1x32xf32>
    %cst_6 = arith.constant dense<0.000000e+00> : vector<1xf32>
    %20 = vector.multi_reduction <add>, %19, %cst_6 [1, 2] : vector<1x1x32xf32> to vector<1xf32>
    %21 = vector.shape_cast %20 : vector<1xf32> to vector<1x1x1xf32>
    %22 = vector.extract %21[0, 0, 0] : f32 from vector<1x1x1xf32>
    %23 = vector.broadcast %22 : f32 to vector<1x1xf32>
    %c0_7 = arith.constant 0 : index
    %c0_8 = arith.constant 0 : index
    %24 = vector.load %arg3[%c0_7, %c0_8] : memref<1x1xf32, #tpu.memory_space<vmem>>, vector<1x1xf32>
    tpu.vector_store %arg3[%c0_7, %c0_8], %23 {strides = array<i32>} : memref<1x1xf32, #tpu.memory_space<vmem>>, vector<1x1xf32>,
    return
  }
  func.func @transform_0(%arg0: i32) -> (i32, i32) {
    %c0_i32 = arith.constant 0 : i32
    %c0_i32_0 = arith.constant 0 : i32
    return %c0_i32, %arg0 : i32, i32
  }
  func.func @transform_1(%arg0: i32) -> (i32, i32) {
    %c0_i32 = arith.constant 0 : i32
    %c0_i32_0 = arith.constant 0 : i32
    return %c0_i32, %arg0 : i32, i32
  }
  func.func @transform_2(%arg0: i32) -> (i32, i32) {
    %c0_i32 = arith.constant 0 : i32
    %c0_i32_0 = arith.constant 0 : i32
    return %arg0, %c0_i32 : i32, i32
  }
}

</mosaic_0001>

<bundles_post_ra>
// kernel: tpu_custom_call.1
= control target key start
LH: loop header
LB: loop body
LE: loop exit
PB: predicated region body
PF: predicated region fallthrough
CT: control target
= control target key end

     0   :  { %7 = vsyncpa [#allocation3], 0  ;;  %s220_s0 = inlined_call_operand.hbm [shape: f32[16,32], index: 0, kind: input, shape index: {}]   ;;  %s221_s1 = inlined_call_operand.vmem [shape: s32[1,32], index: 1, kind: input, shape index: {}]   ;;  %s222_s2 = inlined_call_operand.hbm [shape: f32[1,1], index: 2, kind: output, shape index: {}]  }
   0x1   :  { %8 = vsyncpa [#allocation4], 0  ;;  %s168_s9 = smov [#allocation2]   ;;  %s120_s13 = scalar_lea.hbm %s220_s0, 256 }
   0x2   :  { %s14_s10 = sshll.u32 %s168_s9, 4  ;;  %p121_p0 = scmp.ne.s32.totalorder %s220_s0, %s120_s13  ;;  %s15_s10 = int_to_ptr.vmem [resolvable:$true] %s14_s10 }
   0x3   :  { %p124_p1 = scmp.lt.u32.totalorder %s120_s13, %s220_s0 }
   0x5   :  { %p126_p2 = pnand %p124_p1, %p121_p0 }
   0x7   :  { %129 = shalt.err (!%p126_p2)
}
   0x8   :  { %s130_s18 = scalar_lea.vmem %s15_s10, 256  ;;  %p135_p4 = scmp.lt.s32.totalorder %s15_s10, %s15_s10 }
   0x9   :  { %p131_p3 = scmp.ne.s32.totalorder %s15_s10, %s130_s18  ;;  %p136_p5 = scmp.lt.s32.totalorder %s130_s18, %s130_s18 }
   0xb   :  { %p137_p6 = por %p136_p5, %p135_p4 }
   0xd   :  { %p138_p7 = pnand %p137_p6, %p131_p3 }
   0xf   :  { %141 = shalt.err (!%p138_p7)
}
  0x10   :  { %s169_s19 = smov 128   ;;  %s170_s20 = smov 8  }
  0x11   :  { %20 = dma.hbm_to_vmem [thread:$0]  %s220_s0, 256, %s15_s10, [#allocation3], %s169_s19, %s169_s19, %s170_s20  }
  0x12   :  { %164 = dma.done.wait [#allocation3], 256  }
  0x13   :  { %165 = vsyncadd [#allocation3], 4294967040  ;;  %vm29_vm0 = vcmask 261120   ;;  %v26_v0 = vld [vmem:[#allocation2] sm:$0xff]  ;;  %v27_v1 = vld [vmem:[#allocation2 + $0x8] sm:$0xff]  ;;  %v57_v10 = vlaneseq  ;;  %vm78_vm3 = vcmask 253952  }
  0x14   :  { %v30_v2 = vsel %vm29_vm0, %v26_v0, -inf  ;;  %v31_v3 = vsel %vm29_vm0, %v27_v1, -inf  ;;  %v107_v18 = vld [vmem:[%s221_s1] ss:$0 sm:$0xff]  ;;  %s171_s1 = smov [#allocation5]   ;;  %vm90_vm4 = vcmask 0  }
  0x15   :  { %v32_v4 = vmax.f32 %v30_v2, %v31_v3  ;;  %v58_v14 = vshrl.u32 %v57_v10, 7  ;;  %s98_s24 = sshll.u32 %s171_s1, 4  ;;  %s99_s24 = int_to_ptr.vmem [resolvable:$true] %s98_s24 }
  0x16   :  { %s142_s26 = scalar_lea.vmem %s99_s24, 16  ;;  %s146_s27 = scalar_lea.vmem %s99_s24, 32 }
  0x17   :  { %v33_v5 = vrot.slane %v32_v4, 4  ;;  %v59_v17 = vadd.s32 8, %v58_v14  ;;  %vm64_vm1 = vcmp.eq.s32.totalorder %v58_v14, %v107_v18  ;;  %p143_p8 = scmp.ne.s32.totalorder %s99_s24, %s142_s26  ;;  %p147_p9 = scmp.lt.s32.totalorder %s99_s24, %s99_s24 }
  0x18   :  { %v66_v19 = vsel %vm64_vm1, %v26_v0, 0.0  ;;  %p148_p10 = scmp.lt.s32.totalorder %s146_s27, %s142_s26 }
  0x19   :  { %v34_v6 = vmax.f32 %v32_v4, %v33_v5  ;;  %vm65_vm2 = vcmp.eq.s32.totalorder %v59_v17, %v107_v18  ;;  %v68_v24 = vsel %vm29_vm0, %v66_v19, 0.0 }
  0x1a   :  { %v67_v20 = vsel %vm65_vm2, %v27_v1, 0.0  ;;  %p149_p11 = por %p148_p10, %p147_p9 }
  0x1b   :  { %v35_v7 = vrot.slane %v34_v6, 2  ;;  %v69_v25 = vsel %vm29_vm0, %v67_v20, 0.0 }
  0x1c   :  { %v70_v28 = vadd.f32 %v69_v25, %v68_v24  ;;  %p150_p12 = pnand %p149_p11, %p143_p8 }
  0x1d   :  { %v36_v8 = vmax.f32 %v34_v6, %v35_v7 }
  0x1e   :  { %v71_v31 = vrot.slane %v70_v28, 4 }
  0x1f   :  { %v37_v9 = vrot.slane %v36_v8, 1 }
  0x20   :  { %v72_v34 = vadd.f32 %v71_v31, %v70_v28 }
  0x21   :  { %v38_v11 = vmax.f32 %v36_v8, %v37_v9 }
  0x22   :  { %v73_v37 = vrot.slane %v72_v34, 2 }
  0x23   :  { %v39_v12 = vsub.f32 %v26_v0, %v38_v11  ;;  %v40_v13 = vsub.f32 %v27_v1, %v38_v11 }
  0x24   :  { %v74_v38 = vadd.f32 %v73_v37, %v72_v34 }
  0x25   :  { %v41_v15 = vmul.f32 1.442695, %v39_v12  ;;  %v43_v16 = vmul.f32 1.442695, %v40_v13 }
  0x26   :  { %v75_v39 = vrot.slane %v74_v38, 1 }
  0x27   :  { %114 = vpow2.f32 %v41_v15 }
  0x28   :  { %116 = vpow2.f32 %v43_v16  ;;  %v76_v42 = vadd.f32 %v75_v39, %v74_v38 }
  0x31   :  { %v115_v21 = vpop.eup %114 }
  0x32   :  { %v117_v22 = vpop.eup %116  ;;  %v45_v23 = vsel %vm29_vm0, %v115_v21, 0.0 }
  0x33   :  { %v46_v26 = vsel %vm29_vm0, %v117_v22, 0.0 }
  0x34   :  { %v47_v27 = vadd.f32 %v46_v26, %v45_v23 }
  0x36   :  { %v48_v29 = vrot.slane %v47_v27, 4 }
  0x38   :  { %v49_v30 = vadd.f32 %v48_v29, %v47_v27 }
  0x3a   :  { %v50_v32 = vrot.slane %v49_v30, 2 }
  0x3c   :  { %v51_v33 = vadd.f32 %v50_v32, %v49_v30 }
  0x3e   :  { %v52_v35 = vrot.slane %v51_v33, 1 }
  0x40   :  { %v53_v36 = vadd.f32 %v52_v35, %v51_v33 }
  0x42   :  { %118 = vlog2.f32 %v53_v36 }
  0x4c   :  { %v119_v40 = vpop.eup %118 }
  0x4d   :  { %v55_v41 = vmul.f32 0.6931472, %v119_v40 }
  0x4f   :  { %v56_v43 = vadd.f32 %v55_v41, %v38_v11 }
  0x51   :  { %v77_v44 = vsub.f32 %v76_v42, %v56_v43 }
  0x53   :  { %v79_v45 = vsel %vm78_vm3, %v77_v44, 0.0 }
  0x54   :  { %80 = vadd.xlane.f32.xlu0 %v79_v45 }
  0xe1   :  { %v81_v46 = vpop.xlane.xlu0 %80 }
  0xe2   :  { %v82_v47 = vrot.slane %v81_v46, 4 }
  0xe4   :  { %v83_v48 = vadd.f32 %v82_v47, %v81_v46 }
  0xe6   :  { %v84_v49 = vrot.slane %v83_v48, 2 }
  0xe8   :  { %v85_v50 = vadd.f32 %v84_v49, %v83_v48 }
  0xea   :  { %v86_v51 = vrot.slane %v85_v50, 1 }
  0xec   :  { %v87_v52 = vadd.f32 %v86_v51, %v85_v50 }
  0xee   :  { %108 = vpush %v87_v52 }
 0x11f   :  { %s109_s25 = spop %108 }
 0x120   :  { %v89_v53 = vstv %s109_s25 }
 0x121   :  { %91 = vst.msk [vmem:[#allocation5] sm:$0x1] %vm90_vm4, %v89_v53 }
 0x122   :  { %153 = shalt.err (!%p150_p12)
}
 0x123   :  { %s154_s30 = scalar_lea.hbm %s222_s2, 16 }
 0x124   :  { %p155_p13 = scmp.ne.s32.totalorder %s222_s2, %s154_s30  ;;  %p158_p0 = scmp.lt.u32.totalorder %s154_s30, %s222_s2 }
 0x126   :  { %p160_p1 = pnand %p158_p0, %p155_p13 }
 0x128   :  { %163 = shalt.err (!%p160_p1)
}
 0x129   :  { %101 = dma.vmem_to_hbm [thread:$0]  %s99_s24, 16, %s222_s2, [#allocation4]  }
 0x12a   :  { %166 = dma.done.wait [#allocation4], 16  }
 0x12b   :  { %167 = vsyncadd [#allocation4], 4294967280 }
 0x12c   :  { %105 = vsyncpa [#allocation3], 1 }
 0x12d   :  { %106 = vsyncpa [#allocation4], 1 }

</bundles_post_ra>
